<compile_context>
chip_gen: v5e
topology: v5e:2x2
jax: 0.10.0
libtpu: 0.0.40
codegen_flags: <defaults>
</compile_context>

<pallas_src>
import functools

import jax
import jax.numpy as jnp
from jax.experimental import pallas as pl
from jax.experimental.pallas import tpu as pltpu


def deepfm_kernel(flat_ref, w1_ref, b1_ref, w2_ref, b2_ref, w3_ref, b3_ref,
                  out_ref, *, n_fields, dim):
    """One batch tile. flat_ref is (F*D, TB) bf16 with the batch on lanes."""
    xt = flat_ref[...].astype(jnp.float32)                     # (F*D, TB)

    # ---- per-field max_norm=1 renorm (fused; rows arrive un-normalized) ----
    fields = []
    for f in range(n_fields):
        xf = xt[f * dim:(f + 1) * dim, :]                      # (D, TB) static slice
        sq = jnp.sum(xf * xf, axis=0, keepdims=True)           # (1, TB)
        scale = 1.0 / jnp.maximum(jnp.sqrt(sq), 1.0)
        fields.append(xf * scale)
    x = jnp.concatenate(fields, axis=0)                        # (F*D, TB) f32

    # ---- FM cross term: sum_d[(sum_f x)^2 - sum_f x^2] ----
    s = fields[0]
    for f in range(1, n_fields):
        s = s + fields[f]                                      # (D, TB)
    fm = (jnp.sum(s * s, axis=0, keepdims=True)
          - jnp.sum(x * x, axis=0, keepdims=True))             # (1, TB)

    # ---- deep branch: Linear/ReLU/Linear/ReLU/Linear/Sigmoid ----
    xb = x.astype(jnp.bfloat16)
    h1 = jnp.dot(w1_ref[...], xb,
                 preferred_element_type=jnp.float32) + b1_ref[...]
    h1 = jnp.maximum(h1, 0.0)                                  # (d1, TB)
    h2 = jnp.dot(w2_ref[...], h1.astype(jnp.bfloat16),
                 preferred_element_type=jnp.float32) + b2_ref[...]
    h2 = jnp.maximum(h2, 0.0)                                  # (d2, TB)
    # Final N=1 layer on the VPU/XLU (a padded MXU GEMV would be wasted work).
    deep_logit = jnp.sum(h2 * w3_ref[...], axis=0, keepdims=True) + b3_ref[...]
    deep = jax.nn.sigmoid(deep_logit)                          # (1, TB)

    # Module applies sigmoid twice: sigmoid(fm + sigmoid(mlp)).  Intentional.
    out_ref[...] = jax.nn.sigmoid(fm + deep)                   # (1, TB)


def deep_fm_forward(params, u, i, item_df, *, tb=128):
    # Embedding gathers stay in XLA (see TODO at top of file); renorm is fused
    # into the kernel so XLA never materializes a renormed copy.
    user_rows = params["users"][u][:, None, :]                 # (B, 1, D)
    item_rows = params["item_features"][item_df[i]]            # (B, C, D)
    feats = jnp.concatenate([user_rows, item_rows], axis=1)    # (B, F, D)
    B, F, D = feats.shape

    # Batch-on-lanes layout; bf16 for the DMA-dominant activation buffer.
    flat_t = feats.reshape(B, F * D).T.astype(jnp.bfloat16)    # (F*D, B)

    w1 = params["w1"].astype(jnp.bfloat16)                     # (d1, F*D)
    w2 = params["w2"].astype(jnp.bfloat16)                     # (d2, d1)
    b1 = params["b1"].reshape(-1, 1).astype(jnp.float32)       # (d1, 1)
    b2 = params["b2"].reshape(-1, 1).astype(jnp.float32)       # (d2, 1)
    w3 = params["w3"].reshape(-1, 1).astype(jnp.float32)       # (d2, 1)
    b3 = params["b3"].reshape(1, 1).astype(jnp.float32)        # (1, 1)
    d1, d2 = w1.shape[0], w2.shape[0]

    tb = B if B <= tb else tb                                  # small VMEM tiles
    grid = (pl.cdiv(B, tb),)
    const = lambda g: (0, 0)

    out = pl.pallas_call(
        functools.partial(deepfm_kernel, n_fields=F, dim=D),
        out_shape=jax.ShapeDtypeStruct((1, B), jnp.float32),
        grid=grid,
        in_specs=[
            pl.BlockSpec((F * D, tb), lambda g: (0, g)),       # tiled activations
            pl.BlockSpec((d1, F * D), const),                  # resident weights
            pl.BlockSpec((d1, 1), const),
            pl.BlockSpec((d2, d1), const),
            pl.BlockSpec((d2, 1), const),
            pl.BlockSpec((d2, 1), const),
            pl.BlockSpec((1, 1), const),
        ],
        out_specs=pl.BlockSpec((1, tb), lambda g: (0, g)),     # lane-dense output
        compiler_params=pltpu.CompilerParams(
            dimension_semantics=("parallel",)),
    )(flat_t, w1, b1, w2, b2, w3, b3)
    return out[0]                                              # (B,)


def deep_fm_reference(params, u, i, item_df):
    # Pure-JAX f32 reference mirroring the PyTorch forward.
    def renorm(rows):
        n = jnp.linalg.norm(rows, axis=-1, keepdims=True)
        return rows / jnp.maximum(n, 1.0)

    user_feats = renorm(params["users"][u])[:, None, :]
    item_feats = renorm(params["item_features"][item_df[i]])
    feats = jnp.concatenate([user_feats, item_feats], axis=1)
    s = jnp.sum(feats, axis=1)
    fm = jnp.sum(s * s - jnp.sum(feats * feats, axis=1), axis=1)
    xf = feats.reshape(feats.shape[0], -1)
    h1 = jax.nn.relu(xf @ params["w1"].T + params["b1"])
    h2 = jax.nn.relu(h1 @ params["w2"].T + params["b2"])
    deep = jax.nn.sigmoid(h2 @ params["w3"].T + params["b3"])[:, 0]
    return jax.nn.sigmoid(fm + deep)


def init_params(key, n_users, n_feature_vals, dim, total_neighbours):
    # PyTorch-style init: embeddings ~ N(0,1); Linear (out,in) ~ U(+-1/sqrt(in)).
    d0 = dim * total_neighbours
    d1, d2 = d0 // 2, d0 // 4
    ks = jax.random.split(key, 8)

    def linear(kw, kb, fin, fout):
        bound = 1.0 / jnp.sqrt(fin)
        w = jax.random.uniform(kw, (fout, fin), jnp.float32, -bound, bound)
        b = jax.random.uniform(kb, (fout,), jnp.float32, -bound, bound)
        return w, b

    w1, b1 = linear(ks[2], ks[3], d0, d1)
    w2, b2 = linear(ks[4], ks[5], d1, d2)
    w3, b3 = linear(ks[6], ks[7], d2, 1)
    return {
        "users": jax.random.normal(ks[0], (n_users, dim), jnp.float32),
        "item_features": jax.random.normal(ks[1], (n_feature_vals, dim),
                                           jnp.float32),
        "w1": w1, "b1": b1, "w2": w2, "b2": b2, "w3": w3, "b3": b3,
    }


if __name__ == "__main__":
    key = jax.random.PRNGKey(0)
    k_df, k_u, k_i, k_p = jax.random.split(key, 4)

    # Small synthetic problem (shapes implied by the module).
    n_users = 32
    n_items = 12
    n_item_cols = 3                       # item_df.shape[1]
    dim = 16
    total_neighbours = 1 + n_item_cols    # F = 4 -> deep input dim = 64

    item_df = jax.random.randint(k_df, (n_items, n_item_cols), 0, 40, jnp.int32)
    n_feature_vals = int(item_df.max()) + 1

    params = init_params(k_p, n_users, n_feature_vals, dim, total_neighbours)

    batch = 256                           # 2 grid steps of TB = 128
    u = jax.random.randint(k_u, (batch,), 0, n_users, jnp.int32)
    i = jax.random.randint(k_i, (batch,), 0, n_items, jnp.int32)

    out = jax.block_until_ready(deep_fm_forward(params, u, i, item_df))
    ref = deep_fm_reference(params, u, i, item_df)

    assert out.shape == (batch,)
    assert bool(jnp.all(jnp.isfinite(out)))
    # bf16 activations/weights vs f32 reference -> loosened tolerance.
    assert jnp.allclose(out, ref, atol=2e-2, rtol=2e-2), (
        float(jnp.max(jnp.abs(out - ref))))

    print("KERNEL_OK")
</pallas_src>

<mosaic_0001>
module attributes {stable_mosaic.version = 11 : i64} {
  func.func @deepfm_kernel(%arg0: i32, %arg1: memref<64x128xbf16, #tpu.memory_space<vmem>>, %arg2: memref<32x64xbf16, #tpu.memory_space<vmem>>, %arg3: memref<32x1xf32, #tpu.memory_space<vmem>>, %arg4: memref<16x32xbf16, #tpu.memory_space<vmem>>, %arg5: memref<16x1xf32, #tpu.memory_space<vmem>>, %arg6: memref<16x1xf32, #tpu.memory_space<vmem>>, %arg7: memref<1x1xf32, #tpu.memory_space<vmem>>, %arg8: memref<1x128xf32, #tpu.memory_space<vmem>>) attributes {dimension_semantics = [#tpu.dimension_semantics<parallel>], iteration_bounds = array<i64: 2>, scalar_prefetch = 0 : i64, scratch_operands = 0 : i64, tpu.core_type = #tpu.core_type<tc>, window_params = [{transform_indices = @transform_0, window_bounds = array<i64: 64, 128>}, {pipeline_mode = #tpu.pipeline_mode<synchronous>, transform_indices = @transform_1, window_bounds = array<i64: 32, 64>}, {pipeline_mode = #tpu.pipeline_mode<synchronous>, transform_indices = @transform_2, window_bounds = array<i64: 32, 1>}, {pipeline_mode = #tpu.pipeline_mode<synchronous>, transform_indices = @transform_3, window_bounds = array<i64: 16, 32>}, {pipeline_mode = #tpu.pipeline_mode<synchronous>, transform_indices = @transform_4, window_bounds = array<i64: 16, 1>}, {pipeline_mode = #tpu.pipeline_mode<synchronous>, transform_indices = @transform_5, window_bounds = array<i64: 16, 1>}, {pipeline_mode = #tpu.pipeline_mode<synchronous>, transform_indices = @transform_6, window_bounds = array<i64: 1, 1>}, {transform_indices = @transform_7, window_bounds = array<i64: 1, 128>}]} {
    %c0 = arith.constant 0 : index
    %c0_0 = arith.constant 0 : index
    %0 = vector.load %arg1[%c0, %c0_0] : memref<64x128xbf16, #tpu.memory_space<vmem>>, vector<64x128xbf16>
    %1 = arith.extf %0 : vector<64x128xbf16> to vector<64x128xf32>
    %2 = vector.extract_strided_slice %1 {offsets = [0, 0], sizes = [16, 128], strides = [1, 1]} : vector<64x128xf32> to vector<16x128xf32>
    %3 = arith.mulf %2, %2 : vector<16x128xf32>
    %cst = arith.constant dense<0.000000e+00> : vector<128xf32>
    %4 = vector.multi_reduction <add>, %3, %cst [0] : vector<16x128xf32> to vector<128xf32>
    %5 = vector.shape_cast %4 : vector<128xf32> to vector<1x128xf32>
    %6 = math.sqrt %5 : vector<1x128xf32>
    %cst_1 = arith.constant 1.000000e+00 : f32
    %7 = vector.broadcast %cst_1 : f32 to vector<1x128xf32>
    %8 = arith.maximumf %6, %7 : vector<1x128xf32>
    %cst_2 = arith.constant 1.000000e+00 : f32
    %9 = vector.broadcast %cst_2 : f32 to vector<1x128xf32>
    %10 = arith.divf %9, %8 : vector<1x128xf32>
    %11 = vector.broadcast %10 : vector<1x128xf32> to vector<16x128xf32>
    %12 = arith.mulf %2, %11 : vector<16x128xf32>
    %13 = vector.extract_strided_slice %1 {offsets = [16, 0], sizes = [16, 128], strides = [1, 1]} : vector<64x128xf32> to vector<16x128xf32>
    %14 = arith.mulf %13, %13 : vector<16x128xf32>
    %cst_3 = arith.constant dense<0.000000e+00> : vector<128xf32>
    %15 = vector.multi_reduction <add>, %14, %cst_3 [0] : vector<16x128xf32> to vector<128xf32>
    %16 = vector.shape_cast %15 : vector<128xf32> to vector<1x128xf32>
    %17 = math.sqrt %16 : vector<1x128xf32>
    %cst_4 = arith.constant 1.000000e+00 : f32
    %18 = vector.broadcast %cst_4 : f32 to vector<1x128xf32>
    %19 = arith.maximumf %17, %18 : vector<1x128xf32>
    %cst_5 = arith.constant 1.000000e+00 : f32
    %20 = vector.broadcast %cst_5 : f32 to vector<1x128xf32>
    %21 = arith.divf %20, %19 : vector<1x128xf32>
    %22 = vector.broadcast %21 : vector<1x128xf32> to vector<16x128xf32>
    %23 = arith.mulf %13, %22 : vector<16x128xf32>
    %24 = vector.extract_strided_slice %1 {offsets = [32, 0], sizes = [16, 128], strides = [1, 1]} : vector<64x128xf32> to vector<16x128xf32>
    %25 = arith.mulf %24, %24 : vector<16x128xf32>
    %cst_6 = arith.constant dense<0.000000e+00> : vector<128xf32>
    %26 = vector.multi_reduction <add>, %25, %cst_6 [0] : vector<16x128xf32> to vector<128xf32>
    %27 = vector.shape_cast %26 : vector<128xf32> to vector<1x128xf32>
    %28 = math.sqrt %27 : vector<1x128xf32>
    %cst_7 = arith.constant 1.000000e+00 : f32
    %29 = vector.broadcast %cst_7 : f32 to vector<1x128xf32>
    %30 = arith.maximumf %28, %29 : vector<1x128xf32>
    %cst_8 = arith.constant 1.000000e+00 : f32
    %31 = vector.broadcast %cst_8 : f32 to vector<1x128xf32>
    %32 = arith.divf %31, %30 : vector<1x128xf32>
    %33 = vector.broadcast %32 : vector<1x128xf32> to vector<16x128xf32>
    %34 = arith.mulf %24, %33 : vector<16x128xf32>
    %35 = vector.extract_strided_slice %1 {offsets = [48, 0], sizes = [16, 128], strides = [1, 1]} : vector<64x128xf32> to vector<16x128xf32>
    %36 = arith.mulf %35, %35 : vector<16x128xf32>
    %cst_9 = arith.constant dense<0.000000e+00> : vector<128xf32>
    %37 = vector.multi_reduction <add>, %36, %cst_9 [0] : vector<16x128xf32> to vector<128xf32>
    %38 = vector.shape_cast %37 : vector<128xf32> to vector<1x128xf32>
    %39 = math.sqrt %38 : vector<1x128xf32>
    %cst_10 = arith.constant 1.000000e+00 : f32
    %40 = vector.broadcast %cst_10 : f32 to vector<1x128xf32>
    %41 = arith.maximumf %39, %40 : vector<1x128xf32>
    %cst_11 = arith.constant 1.000000e+00 : f32
    %42 = vector.broadcast %cst_11 : f32 to vector<1x128xf32>
    %43 = arith.divf %42, %41 : vector<1x128xf32>
    %44 = vector.broadcast %43 : vector<1x128xf32> to vector<16x128xf32>
    %45 = arith.mulf %35, %44 : vector<16x128xf32>
    %46 = tpu.concatenate %12, %23, %34, %45 in 0 : vector<16x128xf32>, vector<16x128xf32>, vector<16x128xf32>, vector<16x128xf32> -> vector<64x128xf32>
    %47 = arith.addf %12, %23 : vector<16x128xf32>
    %48 = arith.addf %47, %34 : vector<16x128xf32>
    %49 = arith.addf %48, %45 : vector<16x128xf32>
    %50 = arith.mulf %49, %49 : vector<16x128xf32>
    %cst_12 = arith.constant dense<0.000000e+00> : vector<128xf32>
    %51 = vector.multi_reduction <add>, %50, %cst_12 [0] : vector<16x128xf32> to vector<128xf32>
    %52 = vector.shape_cast %51 : vector<128xf32> to vector<1x128xf32>
    %53 = arith.mulf %46, %46 : vector<64x128xf32>
    %cst_13 = arith.constant dense<0.000000e+00> : vector<128xf32>
    %54 = vector.multi_reduction <add>, %53, %cst_13 [0] : vector<64x128xf32> to vector<128xf32>
    %55 = vector.shape_cast %54 : vector<128xf32> to vector<1x128xf32>
    %56 = arith.subf %52, %55 : vector<1x128xf32>
    %57 = arith.truncf %46 : vector<64x128xf32> to vector<64x128xbf16>
    %c0_14 = arith.constant 0 : index
    %c0_15 = arith.constant 0 : index
    %58 = vector.load %arg2[%c0_14, %c0_15] : memref<32x64xbf16, #tpu.memory_space<vmem>>, vector<32x64xbf16>
    %cst_16 = arith.constant dense<0.000000e+00> : vector<32x128xf32>
    %59 = tpu.matmul %58, %57, %cst_16 {dimension_numbers = #tpu.dot_dimension_numbers<[1], [0], [0], [1], [0, 0, 1, 1], [], []>} : vector<32x64xbf16>, vector<64x128xbf16>, vector<32x128xf32> -> vector<32x128xf32>
    %c0_17 = arith.constant 0 : index
    %c0_18 = arith.constant 0 : index
    %60 = vector.load %arg3[%c0_17, %c0_18] : memref<32x1xf32, #tpu.memory_space<vmem>>, vector<32x1xf32>
    %61 = vector.broadcast %60 : vector<32x1xf32> to vector<32x128xf32>
    %62 = arith.addf %59, %61 : vector<32x128xf32>
    %cst_19 = arith.constant 0.000000e+00 : f32
    %63 = vector.broadcast %cst_19 : f32 to vector<32x128xf32>
    %64 = arith.maximumf %62, %63 : vector<32x128xf32>
    %c0_20 = arith.constant 0 : index
    %c0_21 = arith.constant 0 : index
    %65 = vector.load %arg4[%c0_20, %c0_21] : memref<16x32xbf16, #tpu.memory_space<vmem>>, vector<16x32xbf16>
    %66 = arith.truncf %64 : vector<32x128xf32> to vector<32x128xbf16>
    %cst_22 = arith.constant dense<0.000000e+00> : vector<16x128xf32>
    %67 = tpu.matmul %65, %66, %cst_22 {dimension_numbers = #tpu.dot_dimension_numbers<[1], [0], [0], [1], [0, 0, 1, 1], [], []>} : vector<16x32xbf16>, vector<32x128xbf16>, vector<16x128xf32> -> vector<16x128xf32>
    %c0_23 = arith.constant 0 : index
    %c0_24 = arith.constant 0 : index
    %68 = vector.load %arg5[%c0_23, %c0_24] : memref<16x1xf32, #tpu.memory_space<vmem>>, vector<16x1xf32>
    %69 = vector.broadcast %68 : vector<16x1xf32> to vector<16x128xf32>
    %70 = arith.addf %67, %69 : vector<16x128xf32>
    %cst_25 = arith.constant 0.000000e+00 : f32
    %71 = vector.broadcast %cst_25 : f32 to vector<16x128xf32>
    %72 = arith.maximumf %70, %71 : vector<16x128xf32>
    %c0_26 = arith.constant 0 : index
    %c0_27 = arith.constant 0 : index
    %73 = vector.load %arg6[%c0_26, %c0_27] : memref<16x1xf32, #tpu.memory_space<vmem>>, vector<16x1xf32>
    %74 = vector.broadcast %73 : vector<16x1xf32> to vector<16x128xf32>
    %75 = arith.mulf %72, %74 : vector<16x128xf32>
    %cst_28 = arith.constant dense<0.000000e+00> : vector<128xf32>
    %76 = vector.multi_reduction <add>, %75, %cst_28 [0] : vector<16x128xf32> to vector<128xf32>
    %77 = vector.shape_cast %76 : vector<128xf32> to vector<1x128xf32>
    %c0_29 = arith.constant 0 : index
    %c0_30 = arith.constant 0 : index
    %78 = vector.load %arg7[%c0_29, %c0_30] : memref<1x1xf32, #tpu.memory_space<vmem>>, vector<1x1xf32>
    %79 = vector.broadcast %78 : vector<1x1xf32> to vector<1x128xf32>
    %80 = arith.addf %77, %79 : vector<1x128xf32>
    %81 = arith.negf %80 : vector<1x128xf32>
    %82 = math.exp %81 : vector<1x128xf32>
    %cst_31 = arith.constant 1.000000e+00 : f32
    %83 = vector.broadcast %cst_31 : f32 to vector<1x128xf32>
    %84 = arith.addf %83, %82 : vector<1x128xf32>
    %85 = arith.divf %83, %84 : vector<1x128xf32>
    %86 = arith.addf %56, %85 : vector<1x128xf32>
    %87 = arith.negf %86 : vector<1x128xf32>
    %88 = math.exp %87 : vector<1x128xf32>
    %cst_32 = arith.constant 1.000000e+00 : f32
    %89 = vector.broadcast %cst_32 : f32 to vector<1x128xf32>
    %90 = arith.addf %89, %88 : vector<1x128xf32>
    %91 = arith.divf %89, %90 : vector<1x128xf32>
    %c0_33 = arith.constant 0 : index
    %c0_34 = arith.constant 0 : index
    %92 = vector.load %arg8[%c0_33, %c0_34] : memref<1x128xf32, #tpu.memory_space<vmem>>, vector<1x128xf32>
    tpu.vector_store %arg8[%c0_33, %c0_34], %91 {strides = array<i32>} : memref<1x128xf32, #tpu.memory_space<vmem>>, vector<1x128xf32>,
    return
  }
  func.func @transform_0(%arg0: i32) -> (i32, i32) {
    %c0_i32 = arith.constant 0 : i32
    %c0_i32_0 = arith.constant 0 : i32
    return %c0_i32, %arg0 : i32, i32
  }
  func.func @transform_1(%arg0: i32) -> (i32, i32) {
    %c0_i32 = arith.constant 0 : i32
    %c0_i32_0 = arith.constant 0 : i32
    %c0_i32_1 = arith.constant 0 : i32
    return %c0_i32, %c0_i32_0 : i32, i32
  }
  func.func @transform_2(%arg0: i32) -> (i32, i32) {
    %c0_i32 = arith.constant 0 : i32
    %c0_i32_0 = arith.constant 0 : i32
    %c0_i32_1 = arith.constant 0 : i32
    return %c0_i32, %c0_i32_0 : i32, i32
  }
  func.func @transform_3(%arg0: i32) -> (i32, i32) {
    %c0_i32 = arith.constant 0 : i32
    %c0_i32_0 = arith.constant 0 : i32
    %c0_i32_1 = arith.constant 0 : i32
    return %c0_i32, %c0_i32_0 : i32, i32
  }
  func.func @transform_4(%arg0: i32) -> (i32, i32) {
    %c0_i32 = arith.constant 0 : i32
    %c0_i32_0 = arith.constant 0 : i32
    %c0_i32_1 = arith.constant 0 : i32
    return %c0_i32, %c0_i32_0 : i32, i32
  }
  func.func @transform_5(%arg0: i32) -> (i32, i32) {
    %c0_i32 = arith.constant 0 : i32
    %c0_i32_0 = arith.constant 0 : i32
    %c0_i32_1 = arith.constant 0 : i32
    return %c0_i32, %c0_i32_0 : i32, i32
  }
  func.func @transform_6(%arg0: i32) -> (i32, i32) {
    %c0_i32 = arith.constant 0 : i32
    %c0_i32_0 = arith.constant 0 : i32
    %c0_i32_1 = arith.constant 0 : i32
    return %c0_i32, %c0_i32_0 : i32, i32
  }
  func.func @transform_7(%arg0: i32) -> (i32, i32) {
    %c0_i32 = arith.constant 0 : i32
    %c0_i32_0 = arith.constant 0 : i32
    return %c0_i32, %arg0 : i32, i32
  }
}

</mosaic_0001>

<bundles_post_ra>
// kernel: tpu_custom_call.1
= control target key start
LH: loop header
LB: loop body
LE: loop exit
PB: predicated region body
PF: predicated region fallthrough
CT: control target
= control target key end

     0   :  { %s1293_s0 = inlined_call_operand.hbm [shape: bf16[64,256], index: 0, kind: input, shape index: {}]   ;;  %s1294_s1 = inlined_call_operand.vmem [shape: bf16[32,64], index: 1, kind: input, shape index: {}]   ;;  %s1295_s2 = inlined_call_operand.vmem [shape: f32[32,1], index: 2, kind: input, shape index: {}]   ;;  %s1296_s3 = inlined_call_operand.vmem [shape: bf16[16,32], index: 3, kind: input, shape index: {}]   ;;  %s1297_s4 = inlined_call_operand.vmem [shape: f32[16,1], index: 4, kind: input, shape index: {}]   ;;  %s1298_s5 = inlined_call_operand.vmem [shape: f32[16,1], index: 5, kind: input, shape index: {}]   ;;  %s1299_s6 = inlined_call_operand.<no memory space> [shape: f32[1,1], index: 6, kind: input, shape index: {}]   ;;  %s1300_s7 = inlined_call_operand.hbm [shape: f32[1,256], index: 7, kind: output, shape index: {}]  }
   0x1   :  { %v12_v0 = vstv %s1299_s6 }
   0x2   :  { %13 = vst [vmem:[#allocation2] sm:$0x1] %v12_v0 }
   0x3   :  { %14 = vsyncpa [#allocation4], 0 }
   0x4   :  { %16 = vsyncpa [#allocation4 + $0x1], 0 }
   0x5   :  { %17 = vsyncpa [#allocation5], 0 }
   0x6   :  { %19 = vsyncpa [#allocation5 + $0x1], 0  ;;  %s1044_s26 = smov 0   ;;  %s1046_s27 = smov 0  }
   0x7   :  { %s1048_s28 = smov 0   ;;  %s1050_s29 = smov 0  }
   0x8 LB: > { %s1065_s6 = sadd.s32 4294967295, %s995_s29   ;;  %s770_s30 = sadd.s32 4294967294, %s995_s29   ;;  %s995_s29 = sphi %s1050_s29, %s1321_s29   ;;  %s991_s28 = sphi %s1048_s28, %s1320_s28   ;;  %s987_s27 = sphi %s1046_s27, %s1319_s27   ;;  %s983_s26 = sphi %s1044_s26, %s1318_s26  }
   0x9   : > { %s1069_s8 = sadd.s32 1, %s995_s29   ;;  %s32_s9 = sadd.s32 1, %s991_s28 }
   0xa   : > { %s29_s10 = ssub.s32 %s995_s29, %s1069_s8  ;;  %p39_p0 = scmp.ne.s32.totalorder %s991_s28, %s987_s27 }
   0xb   : > { %p30_p1 = scmp.eq.s32.totalorder %s29_s10, 0  ;;  %p40_p2 = scmp.eq.s32.totalorder %s995_s29, 0 }
   0xc   : > { %p45_p3 = scmp.ne.s32.totalorder %s987_s27, %s983_s26  ;;  %p46_p4 = scmp.eq.s32.totalorder %s1065_s6, 0 }
   0xd   : > { %s1081_s11 = scalar_select %p30_p1, %s991_s28, %s32_s9  }
   0xe   : > { %p1083_p5 = por %p40_p2, %p39_p0  ;;  %p1087_p6 = por %p46_p4, %p45_p3 }
   0xf   : > { %p195_p7 = scmp.eq.s32.totalorder %s1065_s6, 1  ;;  %p201_p8 = scmp.eq.s32.totalorder %s770_s30, 1 }
  0x10   : > { %p772_p9 = scmp.ge.s32.totalorder %s995_s29, 2  ;;  %p834_p10 = scmp.lt.s32.totalorder %s995_s29, 2 }
  0x11   : > { %p1094_p11 = por %p195_p7, %p39_p0  ;;  %p1098_p12 = por %p201_p8, %p45_p3 }
  0x12   : > { %s239_s16 = sand.u32 1, %s991_s28   ;;  %s774_s17 = sshll.u32 %s995_s29, 2 }
  0x13   : > { %s773_s18 = sshll.u32 %s239_s16, 5  ;;  %s247_s21 = scalar_lea.hbm %s1293_s0, %s774_s17 }
  0x14   : > { %s248_s22 = sshll.u32 %s247_s21, 4  ;;  %s243_s23 = scalar_lea.vmem [#allocation3], %s773_s18  ;;  %s249_s22 = int_to_ptr.hbm [resolvable:$true] %s248_s22 }
  0x15   : > { %s250_s24 = sshll.u32 %s243_s23, 4  ;;  %p1109_p13 = pnand %p834_p10, %p1083_p5  ;;  %s251_s24 = int_to_ptr.vmem [resolvable:$true] %s250_s24 }
  0x16   : > { %p775_p0 = scmp.ge.s32.totalorder %s995_s29, 1  ;;  %s240_s30 = scalar_lea.sflag [#allocation4], %s239_s16 }
  0x17   : > { %s899_s9 = sshra.s32 %s249_s22, 4  ;;  %p903_p2 = pneg %p1109_p13  ;;  %s900_s9 = int_to_ptr.hbm [resolvable:$true] %s899_s9 }
  0x18   : > { %s901_s10 = scalar_lea.hbm %s900_s9, 32  ;;  %s906_s19 = scalar_lea.hbm %s1293_s0, 64 }
  0x19   : > { %p902_p1 = scmp.ne.s32.totalorder %s900_s9, %s901_s10  ;;  %p907_p5 = scmp.lt.s32.totalorder %s900_s9, %s1293_s0 }
  0x1a   : > { %p908_p7 = scmp.lt.s32.totalorder %s906_s19, %s901_s10 }
  0x1b   : > { %p904_p3 = pnand %p903_p2, %p902_p1 }
  0x1c   : > { %p909_p8 = por %p908_p7, %p907_p5 }
  0x1d   : > { %p905_p4 = pneg %p904_p3 }
  0x1f   : > { %p910_p10 = pnand %p909_p8, %p905_p4 }
  0x21   : > { %913 = shalt.err (!%p910_p10)
}
  0x22   : > { %s997_s16 = smov 128   ;;  %s998_s21 = smov 64  }
  0x23   : > { %s999_s23 = smov 4   ;;  %p258_p1 = scmp.lt.s32.totalorder %s995_s29, 3 }
  0x24   : > { %829 = dma.hbm_to_vmem [thread:$0]  (!%p1109_p13), %s249_s22, 512, %s251_s24, %s240_s30, %s997_s16, %s998_s21, %s999_s23  }
  0x25   : > { %p259_p2 = pnand %p775_p0, %p258_p1 }
  0x26   : > { %s1128_s17 = sand.u32 (!%p259_p2), 1, %s987_s27  }
  0x27   : > { %262 = sbr.rel (%p259_p2) target bundleno = 493 (0x1ed), region = 48  ;;  %s776_s9 = sshll.u32 (!%p259_p2), %s1128_s17, 5 }
  0x28   : > { %s265_s10 = scalar_lea.sflag (!%p259_p2), [#allocation4], %s1128_s17  ;;  %s268_s18 = scalar_lea.vmem (!%p259_p2), [#allocation3], %s776_s9 }
  0x2c   : > { %974 = dma.done.wait (%p1087_p6), %s265_s10, 512  }
  0x2d   : > { %976 = vsyncadd (%p1087_p6), %s265_s10, 4294966784  ;;  %v817_v1 = vld [vmem:[%s268_s18 + $0x18] sm:$0xff]   ;;  %v816_v2 = vld [vmem:[%s268_s18 + $0x10] sm:$0xff]   ;;  %s700_s23 = scalar_lea.hbm %s1300_s7, %s1065_s6  ;;  %s298_s9 = scalar_lea.vmem [#allocation6], %s1128_s17 }
  0x2e   : > { %v815_v3 = vld [vmem:[%s268_s18 + $0x8] sm:$0xff]   ;;  %v1136_v4 = vunpack.c.l.bf16 %v817_v1  ;;  %v1138_v5 = vunpack.c.h.bf16 %v817_v1  ;;  %v1140_v6 = vunpack.c.l.bf16 %v816_v2  ;;  %v1142_v7 = vunpack.c.h.bf16 %v816_v2  ;;  %v800_v8 = vld [vmem:[%s268_s18] sm:$0xff]   ;;  %s702_s10 = sshll.u32 %s298_s9, 4  ;;  %s704_s18 = sshll.u32 %s700_s23, 4  ;;  %s703_s10 = int_to_ptr.vmem [resolvable:$true] %s702_s10  ;;  %s705_s18 = int_to_ptr.hbm [resolvable:$true] %s704_s18 }
  0x2f   : > { %v1144_v9 = vunpack.c.l.bf16 %v815_v3  ;;  %v1146_v10 = vunpack.c.h.bf16 %v815_v3  ;;  %v1148_v11 = vunpack.c.l.bf16 %v800_v8  ;;  %v1150_v12 = vunpack.c.h.bf16 %v800_v8  ;;  %s692_s6 = scalar_lea.sflag [#allocation5], %s1128_s17  ;;  %s943_s13 = sshra.s32 %s705_s18, 4  ;;  %s944_s13 = int_to_ptr.hbm [resolvable:$true] %s943_s13 }
  0x30   : > { %v433_v13 = vmul.f32 %v1136_v4, %v1136_v4  ;;  %v434_v14 = vmul.f32 %v1138_v5, %v1138_v5  ;;  %v394_v15 = vmul.f32 %v1140_v6, %v1140_v6  ;;  %v395_v16 = vmul.f32 %v1142_v7, %v1142_v7  ;;  %s945_s22 = scalar_lea.hbm %s944_s13, 1  ;;  %s949_s30 = scalar_lea.hbm %s1300_s7, 2 }
  0x31   : > { %v355_v17 = vmul.f32 %v1144_v9, %v1144_v9  ;;  %v356_v18 = vmul.f32 %v1146_v10, %v1146_v10  ;;  %v316_v19 = vmul.f32 %v1148_v11, %v1148_v11  ;;  %v317_v20 = vmul.f32 %v1150_v12, %v1150_v12  ;;  %p946_p6 = scmp.ne.s32.totalorder %s944_s13, %s945_s22  ;;  %p950_p3 = scmp.lt.s32.totalorder %s944_s13, %s1300_s7 }
  0x32   : > { %v435_v21 = vadd.f32 %v434_v14, %v433_v13  ;;  %v396_v22 = vadd.f32 %v395_v16, %v394_v15  ;;  %p951_p4 = scmp.lt.s32.totalorder %s949_s30, %s945_s22 }
  0x33   : > { %v357_v23 = vadd.f32 %v356_v18, %v355_v17  ;;  %v318_v24 = vadd.f32 %v317_v20, %v316_v19  ;;  %p947_p13 = pnand %p946_p6, %p1094_p11 }
  0x34   : > { %v436_v25 = vrot.slane %v435_v21, 4  ;;  %v397_v26 = vrot.slane %v396_v22, 4  ;;  %p952_p5 = por %p951_p4, %p950_p3 }
  0x35   : > { %v358_v27 = vrot.slane %v357_v23, 4  ;;  %v319_v28 = vrot.slane %v318_v24, 4  ;;  %p948_p0 = pneg %p947_p13 }
  0x36   : > { %v437_v29 = vadd.f32 %v436_v25, %v435_v21  ;;  %v398_v30 = vadd.f32 %v397_v26, %v396_v22 }
  0x37   : > { %v359_v31 = vadd.f32 %v358_v27, %v357_v23  ;;  %v320_v32 = vadd.f32 %v319_v28, %v318_v24  ;;  %p953_p7 = pnand %p952_p5, %p948_p0 }
  0x38   : > { %v438_v33 = vrot.slane %v437_v29, 2  ;;  %v399_v34 = vrot.slane %v398_v30, 2 }
  0x39   : > { %v360_v35 = vrot.slane %v359_v31, 2  ;;  %v321_v36 = vrot.slane %v320_v32, 2 }
  0x3a   : > { %v439_v37 = vadd.f32 %v438_v33, %v437_v29  ;;  %v400_v38 = vadd.f32 %v399_v34, %v398_v30 }
  0x3b   : > { %v361_v39 = vadd.f32 %v360_v35, %v359_v31  ;;  %v322_v40 = vadd.f32 %v321_v36, %v320_v32 }
  0x3c   : > { %v440_v41 = vrot.slane %v439_v37, 1  ;;  %v401_v42 = vrot.slane %v400_v38, 1 }
  0x3d   : > { %v362_v43 = vrot.slane %v361_v39, 1  ;;  %v323_v44 = vrot.slane %v322_v40, 1 }
  0x3e   : > { %v441_v45 = vadd.f32 %v440_v41, %v439_v37  ;;  %v402_v46 = vadd.f32 %v401_v42, %v400_v38  ;;  %v1000_v37 = vmov 0   ;;  %v519_v38 = vld [vmem:[%s1295_s2 + $0x10] sm:$0xff] }
  0x3f   : > { %v363_v47 = vadd.f32 %v362_v43, %v361_v39  ;;  %v324_v48 = vadd.f32 %v323_v44, %v322_v40  ;;  %872 = vset.pattern.permute.xlu0 %v1000_v37  ;;  %873 = vset.pattern.permute.xlu1 %v1000_v37 }
  0x40   : > { %875 = vrsqrt.f32 %v441_v45  ;;  %vm449_vm0 = vcmp.eq.f32.partialorder %v441_v45, inf  ;;  %vm451_vm1 = vcmp.eq.f32.partialorder %v441_v45, 0.0  ;;  %v452_v13 = vand.u32 2147483648, %v441_v45  ;;  %533 = vperm.xlu0 %872, %v519_v38   ;;  %874 = vset.pattern.permute.xlu2 %v1000_v37  ;;  %v623_v38 = vld [vmem:[%s1298_s5 + $0x8] sm:$0xff] }
  0x41   : > { %877 = vrsqrt.f32 %v402_v46  ;;  %vm410_vm2 = vcmp.eq.f32.partialorder %v402_v46, inf  ;;  %vm412_vm3 = vcmp.eq.f32.partialorder %v402_v46, 0.0  ;;  %v413_v17 = vand.u32 2147483648, %v402_v46 }
  0x42   : > { %879 = vrsqrt.f32 %v363_v47  ;;  %vm371_vm4 = vcmp.eq.f32.partialorder %v363_v47, inf  ;;  %v374_v20 = vand.u32 2147483648, %v363_v47  ;;  %vm373_vm5 = vcmp.eq.f32.partialorder %v363_v47, 0.0 }
  0x43   : > { %881 = vrsqrt.f32 %v324_v48  ;;  %vm332_vm6 = vcmp.eq.f32.partialorder %v324_v48, inf  ;;  %v335_v30 = vand.u32 2147483648, %v324_v48  ;;  %vm334_vm7 = vcmp.eq.f32.partialorder %v324_v48, 0.0 }
  0x46   : > { %v876_v49 = vpop.eup %875 }
  0x47   : > { %v878_v50 = vpop.eup %877  ;;  %v443_v51 = vmul.f32 %v876_v49, %v441_v45 }
  0x48   : > { %v880_v52 = vpop.eup %879  ;;  %v404_v53 = vmul.f32 %v878_v50, %v402_v46 }
  0x49   : > { %v882_v54 = vpop.eup %881  ;;  %v444_v55 = vmul.f32 %v876_v49, %v443_v51  ;;  %v365_v56 = vmul.f32 %v880_v52, %v363_v47 }
  0x4a   : > { %v405_v57 = vmul.f32 %v878_v50, %v404_v53  ;;  %v326_v58 = vmul.f32 %v882_v54, %v324_v48 }
  0x4b   : > { %v445_v59 = vmul.f32 0.5, %v444_v55  ;;  %v366_v60 = vmul.f32 %v880_v52, %v365_v56 }
  0x4c   : > { %v406_v61 = vmul.f32 0.5, %v405_v57  ;;  %v327_v62 = vmul.f32 %v882_v54, %v326_v58 }
  0x4d   : > { %v446_v63 = vsub.f32 1.5, %v445_v59  ;;  %v367_v0 = vmul.f32 0.5, %v366_v60 }
  0x4e   : > { %v407_v1 = vsub.f32 1.5, %v406_v61  ;;  %v328_v2 = vmul.f32 0.5, %v327_v62 }
  0x4f   : > { %v447_v3 = vmul.f32 %v876_v49, %v446_v63  ;;  %v368_v8 = vsub.f32 1.5, %v367_v0  ;;  %v520_v63 = vld [vmem:[%s1295_s2 + $0x18] sm:$0xff] }
  0x50   : > { %v408_v14 = vmul.f32 %v878_v50, %v407_v1  ;;  %v329_v15 = vsub.f32 1.5, %v328_v2  ;;  %538 = vperm.xlu0 %872, %v520_v63  }
  0x51   : > { %v448_v16 = vmul.f32 %v447_v3, %v441_v45  ;;  %v369_v18 = vmul.f32 %v880_v52, %v368_v8 }
  0x52   : > { %v409_v19 = vmul.f32 %v408_v14, %v402_v46  ;;  %v330_v21 = vmul.f32 %v882_v54, %v329_v15 }
  0x53   : > { %v450_v22 = vsel %vm449_vm0, %v441_v45, %v448_v16  ;;  %v370_v23 = vmul.f32 %v369_v18, %v363_v47 }
  0x54   : > { %v453_v24 = vsel %vm451_vm1, %v452_v13, %v450_v22  ;;  %v411_v25 = vsel %vm410_vm2, %v402_v46, %v409_v19  ;;  %v331_v26 = vmul.f32 %v330_v21, %v324_v48 }
  0x55   : > { %v454_v27 = vmax.f32 %v453_v24, 1.0  ;;  %v414_v28 = vsel %vm412_vm3, %v413_v17, %v411_v25  ;;  %v372_v29 = vsel %vm371_vm4, %v363_v47, %v370_v23  ;;  %v517_v47 = vld [vmem:[%s1295_s2] sm:$0xff]  ;;  %v518_v23 = vld [vmem:[%s1295_s2 + $0x8] sm:$0xff] }
  0x56   : > { %v415_v31 = vmax.f32 %v414_v28, 1.0  ;;  %v375_v32 = vsel %vm373_vm5, %v374_v20, %v372_v29  ;;  %v333_v33 = vsel %vm332_vm6, %v324_v48, %v331_v26  ;;  %523 = vperm.xlu1 %873, %v517_v47  }
  0x57   : > { %883 = vrcp.f32 %v454_v27  ;;  %v376_v34 = vmax.f32 %v375_v32, 1.0  ;;  %v336_v35 = vsel %vm334_vm7, %v335_v30, %v333_v33  ;;  %v464_v39 = vand.u32 2147483647, %v454_v27 }
  0x58   : > { %885 = vrcp.f32 %v415_v31  ;;  %v1169_v36 = vmax.f32 %v336_v35, 1.0  ;;  %v466_v41 = vand.u32 2147483648, %v454_v27  ;;  %v425_v42 = vand.u32 2147483647, %v415_v31 }
  0x59   : > { %887 = vrcp.f32 %v376_v34  ;;  %v427_v45 = vand.u32 2147483648, %v415_v31  ;;  %vm460_vm8 = vweird.f32 %v454_v27  ;;  %vm1178_vm10 = vcmp.eq.f32.partialorder %v464_v39, 8.507059e+37 }
  0x5a   : > { %889 = vrcp.f32 %v1169_v36  ;;  %vm421_vm11 = vweird.f32 %v415_v31  ;;  %v467_v51 = vor.u32 1.1754944e-38, %v466_v41  ;;  %vm1182_vm13 = vcmp.eq.f32.partialorder %v425_v42, 8.507059e+37 }
  0x5b   : > { %v428_v56 = vor.u32 1.1754944e-38, %v427_v45  ;;  %v386_v58 = vand.u32 2147483647, %v376_v34  ;;  %vm382_vm15 = vweird.f32 %v376_v34  ;;  %v388_v61 = vand.u32 2147483648, %v376_v34 }
  0x5c   : > { %vm343_vm2 = vweird.f32 %v1169_v36  ;;  %v347_v13 = vand.u32 2147483647, %v1169_v36  ;;  %v349_v14 = vand.u32 2147483648, %v1169_v36 }
  0x5d   : > { %v884_v40 = vpop.eup %883  ;;  %vm1205_vm3 = vcmp.eq.f32.partialorder %v386_v58, 8.507059e+37  ;;  %v389_v21 = vor.u32 1.1754944e-38, %v388_v61 }
  0x5e   : > { %v886_v43 = vpop.eup %885  ;;  %v456_v44 = vmul.f32 %v884_v40, %v454_v27  ;;  %vm461_vm9 = vweird.f32 %v884_v40  ;;  %528 = vperm.xlu1 %873, %v518_v23   ;;  %vm348_vm7 = vcmp.eq.f32.partialorder %v347_v13, 8.507059e+37 }
  0x5f   : > { %v417_v46 = vmul.f32 %v886_v43, %v415_v31  ;;  %v888_v50 = vpop.eup %887  ;;  %vm422_vm12 = vweird.f32 %v886_v43  ;;  %vm1187_vm14 = vmor %vm460_vm8, %vm461_vm9  ;;  %v350_v31 = vor.u32 1.1754944e-38, %v349_v14  ;;  %vm551_vm8 = vcmask 523264   ;;  %v643_v14 = vld [vmem:[#allocation2] sm:$0x1] }
  0x60   : > { %v457_v48 = vsub.f32 1.0, %v456_v44  ;;  %v890_v54 = vpop.eup %889  ;;  %v378_v57 = vmul.f32 %v888_v50, %v376_v34  ;;  %vm1196_vm0 = vmor %vm421_vm11, %vm422_vm12  ;;  %vm383_vm1 = vweird.f32 %v888_v50  ;;  %vm602_vm9 = vcmask 261120  }
  0x61   : > { %v418_v52 = vsub.f32 1.0, %v417_v46  ;;  %v339_v62 = vmul.f32 %v890_v54, %v1169_v36  ;;  %vm344_vm4 = vweird.f32 %v890_v54  ;;  %vm1214_vm5 = vmor %vm382_vm15, %vm383_vm1 }
  0x62   : > { %v458_v55 = vmul.f32 %v884_v40, %v457_v48  ;;  %v379_v2 = vsub.f32 1.0, %v378_v57  ;;  %vm345_vm6 = vmor %vm343_vm2, %vm344_vm4 }
  0x63   : > { %v419_v60 = vmul.f32 %v886_v43, %v418_v52  ;;  %v340_v8 = vsub.f32 1.0, %v339_v62 }
  0x64   : > { %v459_v0 = vadd.f32 %v884_v40, %v458_v55  ;;  %v380_v16 = vmul.f32 %v888_v50, %v379_v2  ;;  %v797_v55 = vld [vmem:[%s1294_s1 + $0x8] sm:$0xff] }
  0x65   : > { %v420_v3 = vadd.f32 %v886_v43, %v419_v60  ;;  %v341_v22 = vmul.f32 %v890_v54, %v340_v8  ;;  %v586_v2 = vld [vmem:[%s1297_s4 + $0x8] sm:$0xff] }
  0x66   : > { %v463_v15 = vsel %vm1187_vm14, %v884_v40, %v459_v0  ;;  %v381_v27 = vadd.f32 %v888_v50, %v380_v16  ;;  %631 = vperm.xlu1 %873, %v623_v38   ;;  %v585_v0 = vld [vmem:[%s1297_s4] sm:$0xff] }
  0x67   : > { %v468_v18 = vsel %vm1178_vm10, %v467_v51, %v463_v15  ;;  %v424_v19 = vsel %vm1196_vm0, %v886_v43, %v420_v3  ;;  %v342_v30 = vadd.f32 %v890_v54, %v341_v22  ;;  %589 = vperm.xlu2 %874, %v585_v0  }
  0x68   : > { %v470_v24 = vmul.f32 %v1136_v4, %v468_v18  ;;  %v471_v25 = vmul.f32 %v1138_v5, %v468_v18  ;;  %v429_v26 = vsel %vm1182_vm13, %v428_v56, %v424_v19  ;;  %v385_v4 = vsel %vm1214_vm5, %v888_v50, %v381_v27  ;;  %v622_v5 = vld [vmem:[%s1298_s5] sm:$0xff] }
  0x69   : > { %v431_v28 = vmul.f32 %v1140_v6, %v429_v26  ;;  %v432_v29 = vmul.f32 %v1142_v7, %v429_v26  ;;  %v390_v6 = vsel %vm1205_vm3, %v389_v21, %v385_v4  ;;  %v346_v35 = vsel %vm345_vm6, %v890_v54, %v342_v30  ;;  %626 = vperm.xlu0 %872, %v622_v5   ;;  %v796_v56 = vld [vmem:[%s1294_s1] sm:$0xff] }
  0x6a   : > { %v512_v32 = vpack.c.bf16 %v471_v25, %v470_v24  ;;  %v392_v7 = vmul.f32 %v1144_v9, %v390_v6  ;;  %v393_v34 = vmul.f32 %v1146_v10, %v390_v6  ;;  %v351_v36 = vsel %vm348_vm7, %v350_v31, %v346_v35 }
  0x6b   : > { %v511_v33 = vpack.c.bf16 %v432_v29, %v431_v28  ;;  %v353_v37 = vmul.f32 %v1148_v11, %v351_v36  ;;  %v354_v39 = vmul.f32 %v1150_v12, %v351_v36  ;;  %v491_v49 = vmul.f32 %v431_v28, %v431_v28 }
  0x6c   : > { %818 = vmatpush.bf16.msra.mxu2 %v512_v32  ;;  %562 = vmatpush.bf16.msra.mxu0 %v512_v32  ;;  %v510_v40 = vpack.c.bf16 %v393_v34, %v392_v7  ;;  %v489_v43 = vmul.f32 %v392_v7, %v392_v7  ;;  %v490_v45 = vmul.f32 %v393_v34, %v393_v34 }
  0x6d   : > { %v472_v41 = vadd.f32 %v392_v7, %v353_v37  ;;  %v487_v42 = vmul.f32 %v353_v37, %v353_v37  ;;  %v473_v9 = vadd.f32 %v393_v34, %v354_v39  ;;  %v488_v44 = vmul.f32 %v354_v39, %v354_v39 }
  0x6e   : > { %v509_v48 = vpack.c.bf16 %v354_v39, %v353_v37  ;;  %v492_v52 = vmul.f32 %v432_v29, %v432_v29  ;;  %v493_v57 = vmul.f32 %v470_v24, %v470_v24  ;;  %v494_v60 = vmul.f32 %v471_v25, %v471_v25 }
  0x6f   : > { %v474_v10 = vadd.f32 %v472_v41, %v431_v28  ;;  %v475_v46 = vadd.f32 %v473_v9, %v432_v29  ;;  %v495_v47 = vadd.f32 %v488_v44, %v487_v42  ;;  %594 = vperm.xlu2 %874, %v586_v2   ;;  %v798_v29 = vld [vmem:[%s1296_s3] sm:$0xff] }
  0x70   : > { %819 = vmatpush.bf16.msra.mxu2 %v511_v33  ;;  %563 = vmatpush.bf16.msra.mxu0 %v511_v33 }
  0x71   : > { %v476_v11 = vadd.f32 %v474_v10, %v470_v24  ;;  %v477_v50 = vadd.f32 %v475_v46, %v471_v25  ;;  %v496_v12 = vadd.f32 %v495_v47, %v489_v43 }
  0x73   : > { %v478_v51 = vmul.f32 %v476_v11, %v476_v11  ;;  %v479_v53 = vmul.f32 %v477_v50, %v477_v50  ;;  %v497_v54 = vadd.f32 %v496_v12, %v490_v45 }
  0x74   : > { %820 = vmatpush.bf16.msra.mxu2 %v510_v40  ;;  %564 = vmatpush.bf16.msra.mxu0 %v510_v40 }
  0x75   : > { %v480_v58 = vadd.f32 %v479_v53, %v478_v51  ;;  %v498_v59 = vadd.f32 %v497_v54, %v491_v49 }
  0x77   : > { %v499_v61 = vadd.f32 %v498_v59, %v492_v52  ;;  %646 = vperm.xlu2 %874, %v643_v14   ;;  %v481_v32 = vrot.slane %v480_v58, 4 }
  0x78   : > { %821 = vmatpush.bf16.msra.mxu2 %v509_v48  ;;  %565 = vmatpush.bf16.msra.mxu0 %v509_v48 }
  0x79   : > { %v500_v62 = vadd.f32 %v499_v61, %v493_v57  ;;  %v482_v5 = vadd.f32 %v481_v32, %v480_v58 }
  0x7b   : > { %786 = vmatmul.msk.bf16.vlgmr.msra.gmra.mxu2 %vm551_vm8, %v797_v55  ;;  %785 = vmatmul.msk.bf16.vlgmr.msra.gmra.mxu0 %vm551_vm8, %v796_v56  ;;  %v501_v63 = vadd.f32 %v500_v62, %v494_v60  ;;  %v483_v35 = vrot.slane %v482_v5, 2 }
  0x7d   : > { %v502_v4 = vrot.slane %v501_v63, 4  ;;  %v484_v42 = vadd.f32 %v483_v35, %v482_v5 }
  0x7f   : > { %v503_v6 = vadd.f32 %v502_v4, %v501_v63  ;;  %v485_v45 = vrot.slane %v484_v42, 1 }
  0x81   : > { %v504_v38 = vrot.slane %v503_v6, 2  ;;  %v486_v48 = vadd.f32 %v485_v45, %v484_v42 }
  0x83   : > { %v505_v44 = vadd.f32 %v504_v38, %v503_v6 }
  0x85   : > { %v506_v47 = vrot.slane %v505_v44, 1 }
  0x87   : > { %v507_v12 = vadd.f32 %v506_v47, %v505_v44 }
  0x89   : > { %v508_v53 = vsub.f32 %v486_v48, %v507_v12 }
  0xb2   : > { %v534_v3 = vpop.permute.xlu0 %533 }
  0xc1   : > { %v590_v30 = vpop.permute.xlu2 %589 }
  0xc2   : > { %v539_v16 = vpop.permute.xlu0 %538 }
  0xc8   : > { %v524_v8 = vpop.permute.xlu1 %523 }
  0xc9   : > { %v595_v7 = vpop.permute.xlu2 %594 }
  0xd0   : > { %v529_v18 = vpop.permute.xlu1 %528 }
  0xd1   : > { %v647_v51 = vpop.permute.xlu2 %646 }
  0xd2   : > { %v649_v54 = vperm.slane %v647_v51, 0 }
  0xd8   : > { %v632_v41 = vpop.permute.xlu1 %631 }
  0xdb   : > { %v627_v40 = vpop.permute.xlu0 %626 }
  0xf8   : > { %v567_v1 = vpop.f32.mrf.mxu0 }
  0xf9   : > { %v568_v20 = vadd.f32 %v567_v1, %v524_v8 }
  0xfb   : > { %v577_v25 = vmax.f32 %v568_v20, 0.0 }
  0xfe   : > { %v572_v13 = vpop.f32.mrf.mxu2 }
  0xff   : > { %v573_v17 = vadd.f32 %v572_v13, %v534_v3 }
 0x100   : > { %v569_v15 = vpop.f32.mrf.mxu0 }
 0x101   : > { %v570_v21 = vadd.f32 %v569_v15, %v529_v18  ;;  %v579_v23 = vmax.f32 %v573_v17, 0.0 }
 0x103   : > { %v578_v26 = vmax.f32 %v570_v21, 0.0 }
 0x105   : > { %v583_v28 = vpack.c.bf16 %v578_v26, %v577_v25 }
 0x106   : > { %v574_v19 = vpop.f32.mrf.mxu2 }
 0x107   : > { %v575_v22 = vadd.f32 %v574_v19, %v539_v16 }
 0x109   : > { %v580_v24 = vmax.f32 %v575_v22, 0.0 }
 0x10b   : > { %v584_v27 = vpack.c.bf16 %v580_v24, %v579_v23 }
 0x10d   : > { %612 = vmatpush.bf16.msra.mxu1 %v584_v27 }
 0x111   : > { %613 = vmatpush.bf16.msra.mxu1 %v583_v28 }
 0x114   : > { %791 = vmatmul.msk.bf16.vlgmr.msra.gmra.mxu1 %vm602_vm9, %v798_v29 }
 0x191   : > { %v615_v31 = vpop.f32.mrf.mxu1 }
 0x192   : > { %v616_v33 = vadd.f32 %v615_v31, %v590_v30 }
 0x194   : > { %v620_v36 = vmax.f32 %v616_v33, 0.0 }
 0x196   : > { %v634_v43 = vmul.f32 %v627_v40, %v620_v36 }
 0x199   : > { %v617_v34 = vpop.f32.mrf.mxu1 }
 0x19a   : > { %v618_v37 = vadd.f32 %v617_v34, %v595_v7 }
 0x19c   : > { %v621_v39 = vmax.f32 %v618_v37, 0.0 }
 0x19e   : > { %v635_v9 = vmul.f32 %v632_v41, %v621_v39 }
 0x1a0   : > { %v636_v10 = vadd.f32 %v635_v9, %v634_v43 }
 0x1a2   : > { %v637_v46 = vrot.slane %v636_v10, 4 }
 0x1a4   : > { %v638_v11 = vadd.f32 %v637_v46, %v636_v10 }
 0x1a6   : > { %v639_v49 = vrot.slane %v638_v11, 2 }
 0x1a8   : > { %v640_v50 = vadd.f32 %v639_v49, %v638_v11 }
 0x1aa   : > { %v641_v52 = vrot.slane %v640_v50, 1 }
 0x1ac   : > { %v642_v55 = vadd.f32 %v641_v52, %v640_v50 }
 0x1ae   : > { %v650_v56 = vadd.f32 %v649_v54, %v642_v55 }
 0x1b0   : > { %v792_v57 = vmul.f32 -1.442695, %v650_v56 }
 0x1b2   : > { %891 = vpow2.f32 %v792_v57 }
 0x1b8   : > { %v892_v58 = vpop.eup %891 }
 0x1b9   : > { %v654_v59 = vadd.f32 1.0, %v892_v58 }
 0x1bb   : > { %893 = vrcp.f32 %v654_v59  ;;  %v666_v63 = vand.u32 2147483648, %v654_v59  ;;  %v664_v1 = vand.u32 2147483647, %v654_v59  ;;  %vm660_vm11 = vweird.f32 %v654_v59 }
 0x1bd   : > { %v667_v3 = vor.u32 1.1754944e-38, %v666_v63  ;;  %vm665_vm13 = vcmp.eq.f32.partialorder %v664_v1, 8.507059e+37 }
 0x1c1   : > { %v894_v60 = vpop.eup %893 }
 0x1c2   : > { %v656_v61 = vmul.f32 %v894_v60, %v654_v59  ;;  %vm661_vm10 = vweird.f32 %v894_v60 }
 0x1c3   : > { %vm662_vm12 = vmor %vm660_vm11, %vm661_vm10 }
 0x1c4   : > { %v657_v62 = vsub.f32 1.0, %v656_v61 }
 0x1c6   : > { %v658_v0 = vmul.f32 %v894_v60, %v657_v62 }
 0x1c8   : > { %v659_v2 = vadd.f32 %v894_v60, %v658_v0 }
 0x1ca   : > { %v663_v8 = vsel %vm662_vm12, %v894_v60, %v659_v2 }
 0x1cb   : > { %v668_v13 = vsel %vm665_vm13, %v667_v3, %v663_v8 }
 0x1cc   : > { %v670_v14 = vadd.f32 %v668_v13, %v508_v53 }
 0x1ce   : > { %v793_v15 = vmul.f32 -1.442695, %v670_v14 }
 0x1d0   : > { %895 = vpow2.f32 %v793_v15 }
 0x1d6   : > { %v896_v16 = vpop.eup %895 }
 0x1d7   : > { %v674_v17 = vadd.f32 1.0, %v896_v16 }
 0x1d9   : > { %897 = vrcp.f32 %v674_v17  ;;  %v686_v21 = vand.u32 2147483648, %v674_v17  ;;  %v684_v23 = vand.u32 2147483647, %v674_v17  ;;  %vm680_vm15 = vweird.f32 %v674_v17 }
 0x1db   : > { %v687_v25 = vor.u32 1.1754944e-38, %v686_v21  ;;  %vm685_vm1 = vcmp.eq.f32.partialorder %v684_v23, 8.507059e+37 }
 0x1df   : > { %v898_v18 = vpop.eup %897 }
 0x1e0   : > { %v676_v19 = vmul.f32 %v898_v18, %v674_v17  ;;  %vm681_vm14 = vweird.f32 %v898_v18 }
 0x1e1   : > { %vm682_vm0 = vmor %vm680_vm15, %vm681_vm14 }
 0x1e2   : > { %v677_v20 = vsub.f32 1.0, %v676_v19 }
 0x1e4   : > { %v678_v22 = vmul.f32 %v898_v18, %v677_v20 }
 0x1e6   : > { %v679_v24 = vadd.f32 %v898_v18, %v678_v22 }
 0x1e8   : > { %v683_v26 = vsel %vm682_vm0, %v898_v18, %v679_v24 }
 0x1e9   : > { %v688_v27 = vsel %vm685_vm1, %v687_v25, %v683_v26 }
 0x1ea   : > { %690 = vst [vmem:[%s298_s9] sm:$0x1] %v688_v27 }
 0x1eb   : > { %956 = shalt.err (!%p953_p7)
}
 0x1ec   : > { %824 = dma.vmem_to_hbm [thread:$0]  (%p1094_p11), %s703_s10, 16, %s705_s18, %s692_s6  }
 0x1ed PF: > { %s716_s17 = sand.u32 1, %s983_s26   ;;  %p831_p8 = pnand %p772_p9, %p1098_p12 }
 0x1ee   : > { %s717_s20 = scalar_lea.sflag [#allocation5], %s716_s17 }
 0x1ef   : > { %p832_p10 = pneg %p831_p8 }
 0x1f1   : > { %978 = dma.done.wait (%p832_p10), %s717_s20, 16  }
 0x1f2   : > { %980 = vsyncadd (%p832_p10), %s717_s20, 4294967280  ;;  %p22_p1 = scmp.ge.s32.totalorder %s1069_s8, 4   ;;  %s1318_s26 = smov %s987_s27 }
 0x1f3   : > { %s1319_s27 = smov %s991_s28  ;;  %s1320_s28 = smov %s1081_s11 }
 0x1f4   : > { %s1321_s29 = smov %s1069_s8  ;;  %24 = sbr.rel (!%p22_p1) target bundleno = 8 (0x8), region = 93 }
 0x1f9   :  { %722 = vsyncpa [#allocation4], 1 }
 0x1fa   :  { %724 = vsyncpa [#allocation4 + $0x1], 1 }
 0x1fb   :  { %725 = vsyncpa [#allocation5], 1 }
 0x1fc   :  { %727 = vsyncpa [#allocation5 + $0x1], 1 }

</bundles_post_ra>
